<compile_context>
chip_gen: v7x
topology: tpu7x:2x2x1
jax: 0.10.0
libtpu: 0.0.40
codegen_flags: <defaults>
</compile_context>

<pallas_src>
import functools
import math

import jax
import jax.numpy as jnp
from jax.experimental import pallas as pl
from jax.experimental.pallas import tpu as pltpu


def _round_up(v, m):
    return ((v + m - 1) // m) * m


def _device_info():
    kind = ""
    cap = 64 * 1024 * 1024  # conservative fallback = v7x per-TC VMEM
    try:
        kind = jax.devices()[0].device_kind.lower()
    except Exception:
        pass
    try:
        cap = int(pltpu.get_tpu_info().vmem_capacity_bytes)
    except Exception:
        pass
    return kind, cap


_DEVICE_KIND, _VMEM_CAP = _device_info()
_IS_V5E = ("v5e" in _DEVICE_KIND) or ("v5 lite" in _DEVICE_KIND) or ("v5lite" in _DEVICE_KIND)
_IS_V7 = "v7" in _DEVICE_KIND
# Leave headroom for Mosaic internal scratch / semaphores: request ~3/4 of the
# physical per-core VMEM (=> ~48 MiB on v7x's 64 MiB, ~96 MiB on v5e/v6e).
_VMEM_LIMIT = min(_VMEM_CAP * 3 // 4, 100 * 1024 * 1024)
_VMEM_SLACK = 4 * 1024 * 1024


def _sublane_multiple(dtype):
    # Sub-32-bit dtypes pack along sublanes: f32 -> 8-row tiles, bf16 -> 16, int8 -> 32.
    return 8 * max(1, 4 // jnp.dtype(dtype).itemsize)


def _lora_kernel(x_ref, a_ref, b_ref, o_ref, *, compute_dtype):
    # x_ref: [tm, feat_in] (input dtype), a_ref: [feat_in, rank_p] (scale folded,
    # compute dtype), b_ref: [rank_p, feat_out] (compute dtype), o_ref: [tm, feat_out].
    x = x_ref[...]
    if x.dtype != compute_dtype:
        # Cast on the VPU, hidden under MXU/DMA; x is only ever read from HBM in
        # its original dtype (no wrapper-side casted copy).
        x = x.astype(compute_dtype)
    h = jnp.dot(x, a_ref[...], preferred_element_type=jnp.float32)
    # TODO(synk): if this path ever turns compute/VMEM-bound (bf16 on v7x), chunk
    # the row tile with lax.fori_loop(unroll=True) so the [tm, rank_p] f32
    # intermediate never round-trips through VMEM between the two MXU calls.
    o_ref[...] = jnp.dot(h.astype(b_ref.dtype), b_ref[...],
                         preferred_element_type=jnp.float32).astype(o_ref.dtype)


@functools.partial(jax.jit,
                   static_argnames=("block_m", "compute_dtype", "out_dtype"))
def lora_forward(x, a_weight, b_weight, scale, *, block_m=512,
                 compute_dtype=None, out_dtype=None):
    """y = (x @ A.T * scale) @ B.T, fused in a single Pallas kernel.

    x: [..., feat_in]; a_weight: [rank, feat_in]; b_weight: [feat_out, rank].
    compute_dtype: matmul-input dtype; default is bf16 on v5e, else x.dtype.
    out_dtype: output dtype; default x.dtype. Accumulation is always f32.
    """
    out_dt = jnp.dtype(x.dtype) if out_dtype is None else jnp.dtype(out_dtype)
    if compute_dtype is not None:
        cdt = jnp.dtype(compute_dtype)
    elif _IS_V5E and x.dtype == jnp.float32:
        # v5e: f32 MXU is several-x slower, so the padded-K LoRA matmuls stop
        # hiding under DMA; bf16 inputs (f32 accumulation) restore memory-bound.
        cdt = jnp.dtype(jnp.bfloat16)
    else:
        cdt = jnp.dtype(x.dtype)

    feat_in = x.shape[-1]
    rank = a_weight.shape[0]
    feat_out = b_weight.shape[0]
    lead = x.shape[:-1]
    m = math.prod(lead) if lead else 1

    if m == 0:  # degenerate: no rows
        return jnp.zeros((*lead, feat_out), out_dt)

    rank_p = _round_up(max(rank, 1), 128)  # lane-dense h; only tiny weights padded

    # Fold scale into A_t once in f32 (no in-kernel VPU mul, no retrace per scale),
    # then cast the *tiny* weights to the compute dtype in the wrapper.
    scale_f32 = jnp.asarray(scale, dtype=jnp.float32)
    a_t = a_weight.astype(jnp.float32).T * scale_f32            # [feat_in, rank]
    b_t = b_weight.astype(jnp.float32).T                        # [rank, feat_out]
    a_t = jnp.pad(a_t, ((0, 0), (0, rank_p - rank))).astype(cdt)
    b_t = jnp.pad(b_t, ((0, rank_p - rank), (0, 0))).astype(cdt)

    x2d = x.reshape(m, feat_in)                                  # view, no copy

    # ---- Row tile from a per-chip VMEM budget -------------------------------
    x_bytes = jnp.dtype(x.dtype).itemsize
    o_bytes = out_dt.itemsize
    w_bytes = cdt.itemsize
    row_align = max(_sublane_multiple(x.dtype), _sublane_multiple(out_dt))
    # Per row: double-buffered x tile + double-buffered out tile + f32 h.
    per_row = 2 * feat_in * x_bytes + 2 * feat_out * o_bytes + rank_p * 4
    # TODO(synk): single-buffer the constant A_t/B_t blocks (pl.Buffered(1)) to
    # reclaim half of this; budgeted for default double-buffering here.
    weights_vmem = 2 * (feat_in * rank_p + rank_p * feat_out) * w_bytes
    avail = _VMEM_LIMIT - _VMEM_SLACK - weights_vmem
    tm_cap = max(row_align, (max(avail, 0) // per_row) // row_align * row_align)

    tm = min(_round_up(block_m, row_align), tm_cap)
    if _IS_V7 and m > row_align:
        # 2 TensorCores/chip: make sure the "parallel" M axis has >= 2 steps.
        tm = min(tm, _round_up(pl.cdiv(m, 2), row_align))
    if tm >= m:
        tm = m  # single full-extent block: legal for any m (no alignment needed)
    grid_m = pl.cdiv(m, tm)   # ragged M handled by a partial last block

    vmem_limit = min(max(_VMEM_LIMIT, weights_vmem + tm * per_row + _VMEM_SLACK),
                     max(_VMEM_CAP - 2 * 1024 * 1024, _VMEM_SLACK))

    # TODO(synk): for very large feat_out (fused QKV / up-proj) on v7x, add a
    # second grid axis over feat_out instead of only shrinking tm.
    out2d = pl.pallas_call(
        functools.partial(_lora_kernel, compute_dtype=cdt),
        out_shape=jax.ShapeDtypeStruct((m, feat_out), out_dt),
        grid_spec=pltpu.PrefetchScalarGridSpec(
            num_scalar_prefetch=0,
            grid=(grid_m,),
            in_specs=[
                pl.BlockSpec((tm, feat_in), lambda i: (i, 0)),       # x row-tile
                pl.BlockSpec((feat_in, rank_p), lambda i: (0, 0)),   # A_t resident
                pl.BlockSpec((rank_p, feat_out), lambda i: (0, 0)),  # B_t resident
            ],
            out_specs=pl.BlockSpec((tm, feat_out), lambda i: (i, 0)),
        ),
        compiler_params=pltpu.CompilerParams(
            dimension_semantics=("parallel",),   # megacore sharding on v7x
            vmem_limit_bytes=int(vmem_limit),
        ),
    )(x2d, a_t, b_t)

    return out2d.reshape(*lead, feat_out)


def init_lora_params(key, feat_in, feat_out, rank=8):
    """Deterministic init matching the PyTorch module:
       A: kaiming_uniform_(a=sqrt(5)) -> U(-1/sqrt(fan_in), 1/sqrt(fan_in))
       B: zeros
    """
    bound = 1.0 / math.sqrt(feat_in)
    a_w = jax.random.uniform(key, (rank, feat_in), jnp.float32,
                             minval=-bound, maxval=bound)
    b_w = jnp.zeros((feat_out, rank), jnp.float32)
    return a_w, b_w


def lora_reference(x, a_weight, b_weight, scale):
    h = jnp.einsum("...i,ri->...r", x, a_weight) * scale
    return jnp.einsum("...r,or->...o", h, b_weight)


if __name__ == "__main__":
    key = jax.random.PRNGKey(0)
    k_x, k_a, k_b, k_x2, k_a2, k_b2, k_x3 = jax.random.split(key, 7)

    # ---- Small shapes consistent with the module spec -----------------------
    batch, seq, feat_in, feat_out, rank, alpha = 2, 8, 32, 32, 8, 32
    scale = float(alpha) / float(rank)  # bf16(4.0) promotes to f32 in forward

    x = jax.random.normal(k_x, (batch, seq, feat_in), jnp.float32)

    # Faithful-to-module init (B is zero -> output is exactly zero).
    a_w, b_w = init_lora_params(k_a, feat_in, feat_out, rank)
    out = jax.block_until_ready(
        lora_forward(x, a_w, b_w, scale, compute_dtype=jnp.float32))
    ref = lora_reference(x, a_w, b_w, scale)
    assert out.shape == (batch, seq, feat_out)
    assert jnp.allclose(out, ref, atol=1e-5, rtol=1e-5)

    # Non-zero B (non-trivial numeric path), explicit f32 compute.
    b_w_nz = jax.random.normal(k_b, (feat_out, rank), jnp.float32) * 0.05
    out_nz = jax.block_until_ready(
        lora_forward(x, a_w, b_w_nz, scale, compute_dtype=jnp.float32))
    ref_nz = lora_reference(x, a_w, b_w_nz, scale)
    assert jnp.allclose(out_nz, ref_nz, atol=1e-4, rtol=1e-4)

    # Default compute dtype (bf16 on v5e, x.dtype elsewhere) — loose tolerance.
    out_def = jax.block_until_ready(lora_forward(x, a_w, b_w_nz, scale))
    assert jnp.allclose(out_def, ref_nz, atol=5e-2, rtol=5e-2)

    # Explicit bf16 compute (in-kernel cast of x), loose tolerance.
    out_bf = jax.block_until_ready(
        lora_forward(x, a_w, b_w_nz, scale, compute_dtype=jnp.bfloat16))
    assert jnp.allclose(out_bf, ref_nz, atol=5e-2, rtol=5e-2)

    # ---- Larger, tile-aligned shape: multi-block pipelined path -------------
    B2, S2, FI2, FO2, R2 = 4, 256, 256, 256, 8
    x2 = jax.random.normal(k_x2, (B2, S2, FI2), jnp.float32)
    a2 = jax.random.normal(k_a2, (R2, FI2), jnp.float32) * (1.0 / math.sqrt(FI2))
    b2 = jax.random.normal(k_b2, (FO2, R2), jnp.float32) * 0.05
    out2 = jax.block_until_ready(
        lora_forward(x2, a2, b2, scale, compute_dtype=jnp.float32))
    ref2 = lora_reference(x2, a2, b2, scale)
    assert out2.shape == (B2, S2, FO2)
    assert jnp.allclose(out2, ref2, atol=1e-3, rtol=1e-3)

    # ---- Ragged M (not a multiple of the row tile): partial last block ------
    B3, S3 = 3, 100   # m = 300, block_m=128 -> blocks of 128/128/44 rows
    x3 = jax.random.normal(k_x3, (B3, S3, FI2), jnp.float32)
    out3 = jax.block_until_ready(
        lora_forward(x3, a2, b2, scale, compute_dtype=jnp.float32, block_m=128))
    ref3 = lora_reference(x3, a2, b2, scale)
    assert out3.shape == (B3, S3, FO2)
    assert jnp.allclose(out3, ref3, atol=1e-3, rtol=1e-3)

    # ---- Optional bf16 output dtype (halves the output HBM stream) ----------
    out_bf_out = jax.block_until_ready(
        lora_forward(x2, a2, b2, scale, compute_dtype=jnp.float32,
                     out_dtype=jnp.bfloat16))
    assert out_bf_out.dtype == jnp.bfloat16
    assert jnp.allclose(out_bf_out.astype(jnp.float32), ref2, atol=5e-2, rtol=5e-2)

    print("KERNEL_OK")
</pallas_src>

<mosaic_0001>
module attributes {stable_mosaic.version = 11 : i64} {
  func.func @_lora_kernel(%arg0: i32, %arg1: memref<16x32xf32, #tpu.memory_space<vmem>>, %arg2: memref<32x128xf32, #tpu.memory_space<vmem>>, %arg3: memref<128x32xf32, #tpu.memory_space<vmem>>, %arg4: memref<16x32xf32, #tpu.memory_space<vmem>>) attributes {dimension_semantics = [#tpu.dimension_semantics<parallel>], iteration_bounds = array<i64: 1>, scalar_prefetch = 0 : i64, scratch_operands = 0 : i64, tpu.core_type = #tpu.core_type<tc>, window_params = [{transform_indices = @transform_0, window_bounds = array<i64: 16, 32>}, {pipeline_mode = #tpu.pipeline_mode<synchronous>, transform_indices = @transform_1, window_bounds = array<i64: 32, 128>}, {pipeline_mode = #tpu.pipeline_mode<synchronous>, transform_indices = @transform_2, window_bounds = array<i64: 128, 32>}, {transform_indices = @transform_3, window_bounds = array<i64: 16, 32>}]} {
    %c0 = arith.constant 0 : index
    %c0_0 = arith.constant 0 : index
    %0 = vector.load %arg1[%c0, %c0_0] : memref<16x32xf32, #tpu.memory_space<vmem>>, vector<16x32xf32>
    %c0_1 = arith.constant 0 : index
    %c0_2 = arith.constant 0 : index
    %1 = vector.load %arg2[%c0_1, %c0_2] : memref<32x128xf32, #tpu.memory_space<vmem>>, vector<32x128xf32>
    %cst = arith.constant dense<0.000000e+00> : vector<16x128xf32>
    %2 = tpu.matmul %0, %1, %cst {dimension_numbers = #tpu.dot_dimension_numbers<[1], [0], [0], [1], [0, 0, 1, 1], [], []>} : vector<16x32xf32>, vector<32x128xf32>, vector<16x128xf32> -> vector<16x128xf32>
    %c0_3 = arith.constant 0 : index
    %c0_4 = arith.constant 0 : index
    %3 = vector.load %arg3[%c0_3, %c0_4] : memref<128x32xf32, #tpu.memory_space<vmem>>, vector<128x32xf32>
    %cst_5 = arith.constant dense<0.000000e+00> : vector<16x32xf32>
    %4 = tpu.matmul %2, %3, %cst_5 {dimension_numbers = #tpu.dot_dimension_numbers<[1], [0], [0], [1], [0, 0, 1, 1], [], []>} : vector<16x128xf32>, vector<128x32xf32>, vector<16x32xf32> -> vector<16x32xf32>
    %c0_6 = arith.constant 0 : index
    %c0_7 = arith.constant 0 : index
    %5 = vector.load %arg4[%c0_6, %c0_7] : memref<16x32xf32, #tpu.memory_space<vmem>>, vector<16x32xf32>
    tpu.vector_store %arg4[%c0_6, %c0_7], %4 {strides = array<i32>} : memref<16x32xf32, #tpu.memory_space<vmem>>, vector<16x32xf32>,
    return
  }
  func.func @transform_0(%arg0: i32) -> (i32, i32) {
    %c0_i32 = arith.constant 0 : i32
    %c0_i32_0 = arith.constant 0 : i32
    return %arg0, %c0_i32 : i32, i32
  }
  func.func @transform_1(%arg0: i32) -> (i32, i32) {
    %c0_i32 = arith.constant 0 : i32
    %c0_i32_0 = arith.constant 0 : i32
    %c0_i32_1 = arith.constant 0 : i32
    return %c0_i32, %c0_i32_0 : i32, i32
  }
  func.func @transform_2(%arg0: i32) -> (i32, i32) {
    %c0_i32 = arith.constant 0 : i32
    %c0_i32_0 = arith.constant 0 : i32
    %c0_i32_1 = arith.constant 0 : i32
    return %c0_i32, %c0_i32_0 : i32, i32
  }
  func.func @transform_3(%arg0: i32) -> (i32, i32) {
    %c0_i32 = arith.constant 0 : i32
    %c0_i32_0 = arith.constant 0 : i32
    return %arg0, %c0_i32 : i32, i32
  }
}

</mosaic_0001>

<bundles_post_ra>
// kernel: lora_forward.1
= control target key start
LH: loop header
LB: loop body
LE: loop exit
PB: predicated region body
PF: predicated region fallthrough
CT: control target
= control target key end

     0   :  { %vm21_vm0 = vcmask 261120   ;;  %s456_s0 = inlined_call_operand.vmem [shape: f32[16,32], index: 0, kind: input, shape index: {}]   ;;  %s457_s1 = inlined_call_operand.vmem [shape: f32[32,128], index: 1, kind: input, shape index: {}]   ;;  %s458_s2 = inlined_call_operand.vmem [shape: f32[128,32], index: 2, kind: input, shape index: {}]   ;;  %s459_s3 = inlined_call_operand.hbm [shape: f32[16,32], index: 3, kind: output, shape index: {}]  }
   0x1   :  { %v17_v0 = vld [vmem:[%s457_s1] sm:$0xff]  ;;  %v18_v1 = vld [vmem:[%s457_s1 + $0x8] sm:$0xff]  ;;  %v19_v2 = vld [vmem:[%s457_s1 + $0x10] sm:$0xff] }
   0x2   :  { %v284_v3 = vpack.c.bf16 %v18_v1, %v17_v0  ;;  %v20_v4 = vld [vmem:[%s457_s1 + $0x18] sm:$0xff]  ;;  %v15_v5 = vld [vmem:[%s456_s0] sm:$0xff]  ;;  %v104_v8 = vld [vmem:[%s458_s2 + $0x8] sm:$0xff] }
   0x3   :  { %v288_v6 = vpack.c.bf16 %v20_v4, %v19_v2  ;;  %246 = vmatprep.mubr.msk.f32.mxu0 %vm21_vm0, %v15_v5  ;;  %v103_v7 = vld [vmem:[%s458_s2] sm:$0xff]  ;;  %v105_v9 = vld [vmem:[%s458_s2 + $0x10] sm:$0xff]  ;;  %v106_v11 = vld [vmem:[%s458_s2 + $0x18] sm:$0xff] }
   0x4   :  { %285 = vmatprep.subr.bf16.mxu0 %v284_v3  ;;  %v292_v10 = vpack.c.bf16 %v104_v8, %v103_v7  ;;  %v296_v12 = vpack.c.bf16 %v106_v11, %v105_v9  ;;  %v107_v13 = vld [vmem:[%s458_s2 + $0x20] sm:$0xff]  ;;  %v108_v14 = vld [vmem:[%s458_s2 + $0x28] sm:$0xff] }
   0x5   :  { %287 = vmatpush3.bf16.msra.mxu0 %v284_v3  ;;  %v300_v15 = vpack.c.bf16 %v108_v14, %v107_v13 }
   0x6   :  { %289 = vmatprep.subr.bf16.mxu0 %v288_v6  ;;  %293 = vmatprep.subr.bf16.mxu1 %v292_v10 }
   0x7   :  { %295 = vmatpush3.bf16.msra.mxu1 %v292_v10 }
   0x8   :  { %297 = vmatprep.subr.bf16.mxu1 %v296_v12 }
   0x9   :  { %8 = vsyncpa [#allocation3], 0  ;;  %291 = vmatpush3.bf16.msra.mxu0 %v288_v6  ;;  %v16_v16 = vld [vmem:[%s456_s0 + $0x8] sm:$0xff]  ;;  %v109_v17 = vld [vmem:[%s458_s2 + $0x30] sm:$0xff]  ;;  %s351_s27 = smov [#allocation2]  }
   0xa   :  { %v110_v18 = vld [vmem:[%s458_s2 + $0x38] sm:$0xff]  ;;  %v111_v20 = vld [vmem:[%s458_s2 + $0x40] sm:$0xff]  ;;  %v112_v21 = vld [vmem:[%s458_s2 + $0x48] sm:$0xff]  ;;  %s201_s1 = sshll.u32 %s351_s27, 4  ;;  %s202_s1 = int_to_ptr.vmem [resolvable:$true] %s201_s1 }
   0xb   :  { %299 = vmatpush3.bf16.msra.mxu1 %v296_v12  ;;  %v304_v19 = vpack.c.bf16 %v110_v18, %v109_v17  ;;  %v308_v22 = vpack.c.bf16 %v112_v21, %v111_v20  ;;  %v113_v23 = vld [vmem:[%s458_s2 + $0x50] sm:$0xff]  ;;  %v114_v24 = vld [vmem:[%s458_s2 + $0x58] sm:$0xff]  ;;  %v115_v26 = vld [vmem:[%s458_s2 + $0x60] sm:$0xff]  ;;  %p332_p1 = scmp.lt.s32.totalorder %s202_s1, %s202_s1 }
   0xc   :  { %247 = vmatmul.mubr.msk.f32.vlgmr.msra.gmra.mrb[0].mxu0 %vm21_vm0, %v16_v16  ;;  %301 = vmatprep.subr.bf16.mxu1 %v300_v15  ;;  %v312_v25 = vpack.c.bf16 %v114_v24, %v113_v23  ;;  %v116_v27 = vld [vmem:[%s458_s2 + $0x68] sm:$0xff]  ;;  %v117_v29 = vld [vmem:[%s458_s2 + $0x70] sm:$0xff]  ;;  %v118_v30 = vld [vmem:[%s458_s2 + $0x78] sm:$0xff]  ;;  %s327_s2 = scalar_lea.vmem %s202_s1, 256 }
   0xd   :  { %v316_v28 = vpack.c.bf16 %v116_v27, %v115_v26  ;;  %v320_v31 = vpack.c.bf16 %v118_v30, %v117_v29  ;;  %p328_p0 = scmp.ne.s32.totalorder %s202_s1, %s327_s2  ;;  %p333_p2 = scmp.lt.s32.totalorder %s327_s2, %s327_s2 }
   0xf   :  { %303 = vmatpush3.bf16.msra.mxu1 %v300_v15  ;;  %p334_p3 = por %p333_p2, %p332_p1 }
  0x10   :  { %305 = vmatprep.subr.bf16.mxu1 %v304_v19 }
  0x11   :  { %p335_p4 = pnand %p334_p3, %p328_p0 }
  0x13   :  { %307 = vmatpush3.bf16.msra.mxu1 %v304_v19 }
  0x14   :  { %309 = vmatprep.subr.bf16.mxu1 %v308_v22 }
  0x17   :  { %311 = vmatpush3.bf16.msra.mxu1 %v308_v22 }
  0x18   :  { %313 = vmatprep.subr.bf16.mxu1 %v312_v25 }
  0x1b   :  { %315 = vmatpush3.bf16.msra.mxu1 %v312_v25 }
  0x1c   :  { %317 = vmatprep.subr.bf16.mxu1 %v316_v28 }
  0x1f   :  { %319 = vmatpush3.bf16.msra.mxu1 %v316_v28 }
  0x20   :  { %321 = vmatprep.subr.bf16.mxu1 %v320_v31 }
  0x23   :  { %323 = vmatpush3.bf16.msra.mxu1 %v320_v31 }
  0xdf   :  { %v248_v32 = vpop.f32.mrb[0].mxu0 }
  0xe0   :  { %v94_v33 = vpop.f32.mrb[1].mxu0 }
  0xe1   :  { %281 = vmatprep.mubr.f32.mxu1 %v94_v33 }
  0xe2   :  { %282 = vmatmul.mubr.f32.vlgmr.msra.gmra.mrb[0].mxu1 %v248_v32 }
 0x1b5   :  { %v283_v34 = vpop.f32.mrb[0].mxu1 }
 0x1b6   :  { %195 = vst.msk [vmem:[#allocation2 + $0x8] sm:$0xff] %vm21_vm0, %v283_v34  ;;  %v185_v35 = vpop.f32.mrb[1].mxu1 }
 0x1b7   :  { %194 = vst.msk [vmem:[#allocation2] sm:$0xff] %vm21_vm0, %v185_v35 }
 0x1b8   :  { %338 = shalt.err (!%p335_p4)
}
 0x1b9   :  { %s339_s30 = scalar_lea.hbm %s459_s3, 256 }
 0x1ba   :  { %p340_p5 = scmp.ne.s32.totalorder %s459_s3, %s339_s30  ;;  %p343_p6 = scmp.lt.u32.totalorder %s339_s30, %s459_s3 }
 0x1bc   :  { %p345_p7 = pnand %p343_p6, %p340_p5 }
 0x1be   :  { %348 = shalt.err (!%p345_p7)
}
 0x1bf   :  { %s352_s8 = smov 128   ;;  %s353_s9 = smov 8  }
 0x1c0   :  { %207 = dma.vmem_to_hbm [thread:$0]  %s202_s1, 256, %s459_s3, [#allocation3], %s352_s8, %s352_s8, %s353_s9  }
 0x1c1   :  { %349 = dma.done.wait [#allocation3], 256  }
 0x1c2   :  { %350 = vsyncadd [#allocation3], 4294967040 }
 0x1c3   :  { %211 = vsyncpa [#allocation3], 1 }

</bundles_post_ra>
